<compile_context>
chip_gen: v5e
topology: v5e:2x2
jax: 0.10.0
libtpu: 0.0.40
codegen_flags: <defaults>
</compile_context>

<pallas_src>
import functools

import jax
import jax.numpy as jnp
from jax.experimental import pallas as pl
from jax.experimental.pallas import tpu as pltpu


def _round_up(v, m):
    return ((v + m - 1) // m) * m


# ---------------------------------------------------------------------------
# Pallas kernel: batch-tile encoder + fused classifier head
# ---------------------------------------------------------------------------
def clip_cls_kernel(
    patches_ref,   # (Bt, P, K_pad)   bf16, VMEM
    w_embed_ref,   # (K_pad, WIDTH)   bf16 (zero-padded K rows)
    b_embed_ref,   # (1, WIDTH)       f32
    w_fused_ref,   # (WIDTH, N_PAD)   bf16 (diag(ln_g) @ w_proj @ w_cls, padded)
    b_fused_ref,   # (1, N_PAD)       f32  (ln_b @ w_proj @ w_cls + b_cls, padded)
    out_ref,       # (Bt, N_PAD)      f32
):
    Bt, P, Kp = patches_ref.shape
    width = w_embed_ref.shape[1]

    # --- patch embedding: one big (Bt*P, K_pad) x (K_pad, WIDTH) MXU matmul ---
    x = patches_ref[...].reshape(Bt * P, Kp)                    # bf16
    tok = jnp.dot(x, w_embed_ref[...],
                  preferred_element_type=jnp.float32)           # [Bt*P, WIDTH] f32
    tok = tok + b_embed_ref[...]

    # --- LayerNorm, normalize-only (affine folded into the fused tail).
    #     Two-pass (mean-subtracted) variance: no catastrophic cancellation. ---
    mu = jnp.mean(tok, axis=-1, keepdims=True)
    xc = tok - mu
    var = jnp.mean(xc * xc, axis=-1, keepdims=True)
    tok = xc * jax.lax.rsqrt(var + 1e-5)                        # [Bt*P, WIDTH]

    # --- global mean pool over patches, per batch element ---
    pooled = jnp.mean(tok.reshape(Bt, P, width), axis=1)        # [Bt, WIDTH] f32

    # --- fused (ln-affine ∘ proj ∘ classifier): one [Bt,WIDTH]x[WIDTH,N_PAD] ---
    logits = jnp.dot(pooled.astype(w_fused_ref.dtype), w_fused_ref[...],
                     preferred_element_type=jnp.float32)        # [Bt, N_PAD]
    out_ref[...] = logits + b_fused_ref[...]


# ---------------------------------------------------------------------------
# One-time parameter prep (hoisted out of the per-call forward path)
# ---------------------------------------------------------------------------
def prepare_params(params):
    """K-pad + bf16-cast the embed weight and fold LN-affine/proj/classifier."""
    w_embed, b_embed, ln_g, ln_b, w_proj, w_cls, b_cls = params
    patch_dim, width = w_embed.shape
    n_out = w_cls.shape[1]
    k_pad = _round_up(patch_dim, 128)
    n_pad = max(128, _round_up(n_out, 128))

    # K-pad embed weight with zero rows (exact), cast to bf16 for the MXU.
    w_embed_p = jnp.pad(w_embed.astype(jnp.float32),
                        ((0, k_pad - patch_dim), (0, 0)))
    w_embed_bf = w_embed_p.astype(jnp.bfloat16)
    b_embed_f32 = b_embed.astype(jnp.float32).reshape(1, width)

    # Fold LN affine + proj + classifier into one matrix. Exact because
    # mean-pool commutes with the per-feature affine and the tail is linear:
    #   logits = ((h * g + b) @ Wp) @ Wc + bc
    #          = h @ (diag(g) Wp Wc) + (b @ Wp Wc + bc)
    w_tail = jnp.dot(w_proj.astype(jnp.float32), w_cls.astype(jnp.float32))
    w_fused = ln_g.astype(jnp.float32).reshape(width, 1) * w_tail
    b_fused = (jnp.dot(ln_b.astype(jnp.float32).reshape(1, width), w_tail)
               + b_cls.astype(jnp.float32).reshape(1, n_out))

    # Lane-dense output: pad the logit dim to a multiple of 128 (unmasked vst).
    w_fused = jnp.pad(w_fused, ((0, 0), (0, n_pad - n_out))).astype(jnp.bfloat16)
    b_fused = jnp.pad(b_fused, ((0, 0), (0, n_pad - n_out)))

    prepared = dict(w_embed=w_embed_bf, b_embed=b_embed_f32,
                    w_fused=w_fused, b_fused=b_fused)
    return prepared, n_out


# ---------------------------------------------------------------------------
# Forward wrapper (jitted: patchify/cast/pad fuse in front of the pallas_call)
# ---------------------------------------------------------------------------
@functools.partial(jax.jit, static_argnames=("patch", "bt_max", "n_out"))
def clip_classifier_forward(x_nchw, w_embed, b_embed, w_fused, b_fused,
                            *, patch, bt_max, n_out):
    """x_nchw: [B, C, H, W] float32. Returns logits [B, n_out] float32."""
    B, C, H, W = x_nchw.shape
    ph = pw = patch
    gh, gw = H // ph, W // pw
    P = gh * gw
    patch_dim = C * ph * pw
    k_pad, width = w_embed.shape
    n_pad = w_fused.shape[1]

    # ---- patchify NCHW -> [B, P, patch_dim], bf16, zero-pad K to 128-multiple.
    # TODO(synk): with NHWC input this becomes a pure reshape (no transpose).
    xp = x_nchw.reshape(B, C, gh, ph, gw, pw)
    xp = xp.transpose(0, 2, 4, 1, 3, 5).reshape(B, P, patch_dim)
    xp = xp.astype(jnp.bfloat16)
    if k_pad != patch_dim:
        xp = jnp.pad(xp, ((0, 0), (0, 0), (0, k_pad - patch_dim)))

    # ---- batch tiling: sublane-aligned (x8) tiles, ~512 embed rows per step,
    #      and >=2 grid steps when B allows it (keeps both v7x TCs busy).
    bt_target = min(_round_up(max(1, -(-512 // P)), 8), _round_up(bt_max, 8))
    bt_half = _round_up(max(1, -(-B // 2)), 8)
    Bt = min(bt_target, max(8, bt_half))
    B_pad = _round_up(B, Bt)
    if B_pad != B:
        xp = jnp.pad(xp, ((0, B_pad - B), (0, 0), (0, 0)))
    grid = (B_pad // Bt,)

    # ---- explicit scoped-VMEM budget from the per-step footprint, clamped to
    #      stay within v5e (16 MiB default) / v6e (32) / v7x (64 MiB physical).
    vmem_est = (2 * Bt * P * k_pad * 2        # patch tile, bf16, double-buffered
                + 2 * k_pad * width * 2       # embed weight, bf16
                + Bt * P * width * 4          # f32 token activations (live value)
                + 2 * width * n_pad * 2       # fused tail weight, bf16
                + 2 * (Bt + 2) * n_pad * 4)   # output tile + biases
    vmem_limit = int(min(48 << 20, max(16 << 20, 2 * vmem_est)))

    grid_spec = pltpu.PrefetchScalarGridSpec(
        num_scalar_prefetch=0,
        grid=grid,
        in_specs=[
            pl.BlockSpec((Bt, P, k_pad), lambda b: (b, 0, 0)),
            # Weights/biases have constant index_maps -> stay resident across
            # grid steps. TODO(synk): pipeline_mode=pl.Buffered(1) would halve
            # their VMEM reservation at real ViT width; omitted for lowering
            # portability across jax versions.
            pl.BlockSpec((k_pad, width), lambda b: (0, 0)),
            pl.BlockSpec((1, width), lambda b: (0, 0)),
            pl.BlockSpec((width, n_pad), lambda b: (0, 0)),
            pl.BlockSpec((1, n_pad), lambda b: (0, 0)),
        ],
        out_specs=pl.BlockSpec((Bt, n_pad), lambda b: (b, 0)),
    )

    out = pl.pallas_call(
        clip_cls_kernel,
        out_shape=jax.ShapeDtypeStruct((B_pad, n_pad), jnp.float32),
        grid_spec=grid_spec,
        compiler_params=pltpu.CompilerParams(
            dimension_semantics=("parallel",),
            vmem_limit_bytes=vmem_limit),
    )(xp, w_embed, b_embed, w_fused, b_fused)

    return out[:B, :n_out]


# ---------------------------------------------------------------------------
# Stand-in parameter init + pure-JAX reference (for a correctness check)
# ---------------------------------------------------------------------------
def init_params(key, *, patch_dim, width, feat, n_out):
    ks = jax.random.split(key, 5)
    w_embed = jax.random.normal(ks[0], (patch_dim, width), jnp.float32) * 0.02
    b_embed = jnp.zeros((1, width), jnp.float32)
    ln_g = jnp.ones((1, width), jnp.float32)
    ln_b = jnp.zeros((1, width), jnp.float32)
    w_proj = jax.random.normal(ks[1], (width, feat), jnp.float32) * 0.02
    # classifier Linear(512, n_out): torch weight is [n_out, 512]; stored transposed
    w_cls = jax.random.normal(ks[2], (feat, n_out), jnp.float32) * 0.02
    b_cls = jax.random.normal(ks[3], (1, n_out), jnp.float32) * 0.02
    return (w_embed, b_embed, ln_g, ln_b, w_proj, w_cls, b_cls)


def _reference_forward(x_nchw, params, *, patch):
    """Unfused f32 reference of the same stand-in forward (two-step tail)."""
    w_embed, b_embed, ln_g, ln_b, w_proj, w_cls, b_cls = params
    B, C, H, W = x_nchw.shape
    gh, gw = H // patch, W // patch
    xp = x_nchw.reshape(B, C, gh, patch, gw, patch)
    xp = xp.transpose(0, 2, 4, 1, 3, 5).reshape(B, gh * gw, -1)
    tok = xp @ w_embed + b_embed
    mu = tok.mean(-1, keepdims=True)
    var = ((tok - mu) ** 2).mean(-1, keepdims=True)
    tok = (tok - mu) / jnp.sqrt(var + 1e-5) * ln_g + ln_b
    pooled = tok.mean(axis=1)
    feats = pooled @ w_proj
    return feats @ w_cls + b_cls


if __name__ == "__main__":
    key = jax.random.PRNGKey(0)
    k_x, k_p = jax.random.split(key)

    # Small shapes: B=2, C=3, H=W=32, patch=8 -> 16 patches, patch_dim=192->256
    B, C, H, W = 2, 3, 32, 32
    patch = 8
    width = 128        # stand-in encoder width
    feat = 512         # CLIP feature dim (classifier in_features=512)
    n_out = 2          # n_output

    x = jax.random.normal(k_x, (B, C, H, W), jnp.float32)
    params = init_params(k_p, patch_dim=C * patch * patch,
                         width=width, feat=feat, n_out=n_out)

    # One-time weight prep (hoisted out of the forward path).
    prepared, n_out_p = prepare_params(params)
    prepared = jax.tree_util.tree_map(jax.block_until_ready, prepared)

    logits = clip_classifier_forward(
        x, prepared["w_embed"], prepared["b_embed"],
        prepared["w_fused"], prepared["b_fused"],
        patch=patch, bt_max=32, n_out=n_out_p)
    jax.block_until_ready(logits)

    assert logits.shape == (B, n_out) and logits.dtype == jnp.float32

    # Verify the fused bf16 kernel against the unfused f32 reference.
    ref = _reference_forward(x, params, patch=patch)
    err = float(jnp.max(jnp.abs(logits - ref)))
    assert err < 5e-2, f"max |kernel - reference| = {err}"

    print("KERNEL_OK")
</pallas_src>

<mosaic_0001>
module attributes {stable_mosaic.version = 11 : i64} {
  func.func @clip_cls_kernel(%arg0: i32, %arg1: memref<8x16x256xbf16, #tpu.memory_space<vmem>>, %arg2: memref<256x128xbf16, #tpu.memory_space<vmem>>, %arg3: memref<1x128xf32, #tpu.memory_space<vmem>>, %arg4: memref<128x128xbf16, #tpu.memory_space<vmem>>, %arg5: memref<1x128xf32, #tpu.memory_space<vmem>>, %arg6: memref<8x128xf32, #tpu.memory_space<vmem>>) attributes {dimension_semantics = [#tpu.dimension_semantics<parallel>], iteration_bounds = array<i64: 1>, scalar_prefetch = 0 : i64, scratch_operands = 0 : i64, tpu.core_type = #tpu.core_type<tc>, window_params = [{transform_indices = @transform_0, window_bounds = array<i64: 8, 16, 256>}, {pipeline_mode = #tpu.pipeline_mode<synchronous>, transform_indices = @transform_1, window_bounds = array<i64: 256, 128>}, {pipeline_mode = #tpu.pipeline_mode<synchronous>, transform_indices = @transform_2, window_bounds = array<i64: 1, 128>}, {pipeline_mode = #tpu.pipeline_mode<synchronous>, transform_indices = @transform_3, window_bounds = array<i64: 128, 128>}, {pipeline_mode = #tpu.pipeline_mode<synchronous>, transform_indices = @transform_4, window_bounds = array<i64: 1, 128>}, {transform_indices = @transform_5, window_bounds = array<i64: 8, 128>}]} {
    %c0 = arith.constant 0 : index
    %c0_0 = arith.constant 0 : index
    %c0_1 = arith.constant 0 : index
    %0 = vector.load %arg1[%c0, %c0_0, %c0_1] : memref<8x16x256xbf16, #tpu.memory_space<vmem>>, vector<8x16x256xbf16>
    %1 = vector.shape_cast %0 : vector<8x16x256xbf16> to vector<128x256xbf16>
    %c0_2 = arith.constant 0 : index
    %c0_3 = arith.constant 0 : index
    %2 = vector.load %arg2[%c0_2, %c0_3] : memref<256x128xbf16, #tpu.memory_space<vmem>>, vector<256x128xbf16>
    %cst = arith.constant dense<0.000000e+00> : vector<128x128xf32>
    %3 = tpu.matmul %1, %2, %cst {dimension_numbers = #tpu.dot_dimension_numbers<[1], [0], [0], [1], [0, 0, 1, 1], [], []>} : vector<128x256xbf16>, vector<256x128xbf16>, vector<128x128xf32> -> vector<128x128xf32>
    %c0_4 = arith.constant 0 : index
    %c0_5 = arith.constant 0 : index
    %4 = vector.load %arg3[%c0_4, %c0_5] : memref<1x128xf32, #tpu.memory_space<vmem>>, vector<1x128xf32>
    %5 = vector.broadcast %4 : vector<1x128xf32> to vector<128x128xf32>
    %6 = arith.addf %3, %5 : vector<128x128xf32>
    %cst_6 = arith.constant dense<0.000000e+00> : vector<128xf32>
    %7 = vector.multi_reduction <add>, %6, %cst_6 [1] : vector<128x128xf32> to vector<128xf32>
    %8 = vector.shape_cast %7 : vector<128xf32> to vector<128x1xf32>
    %cst_7 = arith.constant 1.280000e+02 : f32
    %9 = vector.broadcast %cst_7 : f32 to vector<128x1xf32>
    %10 = arith.divf %8, %9 : vector<128x1xf32>
    %11 = vector.broadcast %10 : vector<128x1xf32> to vector<128x128xf32>
    %12 = arith.subf %6, %11 : vector<128x128xf32>
    %13 = arith.mulf %12, %12 : vector<128x128xf32>
    %cst_8 = arith.constant dense<0.000000e+00> : vector<128xf32>
    %14 = vector.multi_reduction <add>, %13, %cst_8 [1] : vector<128x128xf32> to vector<128xf32>
    %15 = vector.shape_cast %14 : vector<128xf32> to vector<128x1xf32>
    %cst_9 = arith.constant 1.280000e+02 : f32
    %16 = vector.broadcast %cst_9 : f32 to vector<128x1xf32>
    %17 = arith.divf %15, %16 : vector<128x1xf32>
    %cst_10 = arith.constant 9.99999974E-6 : f32
    %18 = vector.broadcast %cst_10 : f32 to vector<128x1xf32>
    %19 = arith.addf %17, %18 : vector<128x1xf32>
    %20 = math.rsqrt %19 : vector<128x1xf32>
    %21 = vector.broadcast %20 : vector<128x1xf32> to vector<128x128xf32>
    %22 = arith.mulf %12, %21 : vector<128x128xf32>
    %23 = vector.shape_cast %22 : vector<128x128xf32> to vector<8x16x128xf32>
    %cst_11 = arith.constant dense<0.000000e+00> : vector<8x128xf32>
    %24 = vector.multi_reduction <add>, %23, %cst_11 [1] : vector<8x16x128xf32> to vector<8x128xf32>
    %cst_12 = arith.constant 1.600000e+01 : f32
    %25 = vector.broadcast %cst_12 : f32 to vector<8x128xf32>
    %26 = arith.divf %24, %25 : vector<8x128xf32>
    %27 = arith.truncf %26 : vector<8x128xf32> to vector<8x128xbf16>
    %c0_13 = arith.constant 0 : index
    %c0_14 = arith.constant 0 : index
    %28 = vector.load %arg4[%c0_13, %c0_14] : memref<128x128xbf16, #tpu.memory_space<vmem>>, vector<128x128xbf16>
    %cst_15 = arith.constant dense<0.000000e+00> : vector<8x128xf32>
    %29 = tpu.matmul %27, %28, %cst_15 {dimension_numbers = #tpu.dot_dimension_numbers<[1], [0], [0], [1], [0, 0, 1, 1], [], []>} : vector<8x128xbf16>, vector<128x128xbf16>, vector<8x128xf32> -> vector<8x128xf32>
    %c0_16 = arith.constant 0 : index
    %c0_17 = arith.constant 0 : index
    %30 = vector.load %arg5[%c0_16, %c0_17] : memref<1x128xf32, #tpu.memory_space<vmem>>, vector<1x128xf32>
    %31 = vector.broadcast %30 : vector<1x128xf32> to vector<8x128xf32>
    %32 = arith.addf %29, %31 : vector<8x128xf32>
    %c0_18 = arith.constant 0 : index
    %c0_19 = arith.constant 0 : index
    %33 = vector.load %arg6[%c0_18, %c0_19] : memref<8x128xf32, #tpu.memory_space<vmem>>, vector<8x128xf32>
    tpu.vector_store %arg6[%c0_18, %c0_19], %32 {strides = array<i32>} : memref<8x128xf32, #tpu.memory_space<vmem>>, vector<8x128xf32>,
    return
  }
  func.func @transform_0(%arg0: i32) -> (i32, i32, i32) {
    %c0_i32 = arith.constant 0 : i32
    %c0_i32_0 = arith.constant 0 : i32
    %c0_i32_1 = arith.constant 0 : i32
    return %arg0, %c0_i32, %c0_i32_0 : i32, i32, i32
  }
  func.func @transform_1(%arg0: i32) -> (i32, i32) {
    %c0_i32 = arith.constant 0 : i32
    %c0_i32_0 = arith.constant 0 : i32
    %c0_i32_1 = arith.constant 0 : i32
    return %c0_i32, %c0_i32_0 : i32, i32
  }
  func.func @transform_2(%arg0: i32) -> (i32, i32) {
    %c0_i32 = arith.constant 0 : i32
    %c0_i32_0 = arith.constant 0 : i32
    %c0_i32_1 = arith.constant 0 : i32
    return %c0_i32, %c0_i32_0 : i32, i32
  }
  func.func @transform_3(%arg0: i32) -> (i32, i32) {
    %c0_i32 = arith.constant 0 : i32
    %c0_i32_0 = arith.constant 0 : i32
    %c0_i32_1 = arith.constant 0 : i32
    return %c0_i32, %c0_i32_0 : i32, i32
  }
  func.func @transform_4(%arg0: i32) -> (i32, i32) {
    %c0_i32 = arith.constant 0 : i32
    %c0_i32_0 = arith.constant 0 : i32
    %c0_i32_1 = arith.constant 0 : i32
    return %c0_i32, %c0_i32_0 : i32, i32
  }
  func.func @transform_5(%arg0: i32) -> (i32, i32) {
    %c0_i32 = arith.constant 0 : i32
    %c0_i32_0 = arith.constant 0 : i32
    return %arg0, %c0_i32 : i32, i32
  }
}

</mosaic_0001>

<bundles_post_ra>
// kernel: clip_classifier_forward.1
= control target key start
LH: loop header
LB: loop body
LE: loop exit
PB: predicated region body
PF: predicated region fallthrough
CT: control target
= control target key end

     0   :  { %s1818_s1 = inlined_call_operand.vmem [shape: bf16[256,128], index: 1, kind: input, shape index: {}]   ;;  %s1819_s2 = inlined_call_operand.vmem [shape: f32[1,128], index: 2, kind: input, shape index: {}]   ;;  %s1820_s0 = inlined_call_operand.vmem [shape: bf16[8,16,256], index: 0, kind: input, shape index: {}]   ;;  %s1821_s4 = inlined_call_operand.vmem [shape: f32[1,128], index: 4, kind: input, shape index: {}]   ;;  %s1822_s3 = inlined_call_operand.vmem [shape: bf16[128,128], index: 3, kind: input, shape index: {}]   ;;  %s1823_s5 = inlined_call_operand.vmem [shape: f32[8,128], index: 5, kind: output, shape index: {}]  }
   0x1   :  { %v1053_v0 = vld [vmem:[%s1818_s1 + $0x38] sm:$0xff]  ;;  %v1052_v2 = vld [vmem:[%s1818_s1 + $0x30] sm:$0xff]  ;;  %v1051_v4 = vld [vmem:[%s1818_s1 + $0x28] sm:$0xff] }
   0x2   :  { %v1061_v1 = vld [vmem:[%s1818_s1 + $0x78] sm:$0xff]  ;;  %248 = vmatpush.bf16.msra.mxu0 %v1053_v0  ;;  %1070 = vmatpush.bf16.msra.mxu3 %v1053_v0  ;;  %v1060_v3 = vld [vmem:[%s1818_s1 + $0x70] sm:$0xff]  ;;  %v1059_v5 = vld [vmem:[%s1818_s1 + $0x68] sm:$0xff] }
   0x3   :  { %297 = vmatpush.bf16.msra.mxu1 %v1061_v1  ;;  %1078 = vmatpush.bf16.msra.mxu2 %v1061_v1  ;;  %v1050_v6 = vld [vmem:[%s1818_s1 + $0x20] sm:$0xff]  ;;  %v1049_v8 = vld [vmem:[%s1818_s1 + $0x18] sm:$0xff]  ;;  %v1048_v10 = vld [vmem:[%s1818_s1 + $0x10] sm:$0xff] }
   0x4   :  { %v1058_v7 = vld [vmem:[%s1818_s1 + $0x60] sm:$0xff]  ;;  %v1057_v9 = vld [vmem:[%s1818_s1 + $0x58] sm:$0xff]  ;;  %v1056_v11 = vld [vmem:[%s1818_s1 + $0x50] sm:$0xff] }
   0x5   :  { %v1047_v12 = vld [vmem:[%s1818_s1 + $0x8] sm:$0xff]  ;;  %v1046_v14 = vld [vmem:[%s1818_s1] sm:$0xff]  ;;  %v912_v18 = vld [vmem:[%s1820_s0 + $0x50] sm:$0xf] }
   0x6   :  { %249 = vmatpush.bf16.msra.mxu0 %v1052_v2  ;;  %1071 = vmatpush.bf16.msra.mxu3 %v1052_v2  ;;  %v1055_v13 = vld [vmem:[%s1818_s1 + $0x48] sm:$0xff]  ;;  %v1054_v15 = vld [vmem:[%s1818_s1 + $0x40] sm:$0xff]  ;;  %v1041_v19 = vld [vmem:[%s1820_s0 + $0x54] sm:$0xf0] }
   0x7   :  { %298 = vmatpush.bf16.msra.mxu1 %v1060_v3  ;;  %1079 = vmatpush.bf16.msra.mxu2 %v1060_v3  ;;  %v872_v16 = vld [vmem:[%s1820_s0] sm:$0xf]  ;;  %v1031_v17 = vld [vmem:[%s1820_s0 + $0x4] sm:$0xf0]  ;;  %v1030_v20 = vld [vmem:[%s1820_s0 + $0x4] sm:$0xf]  ;;  %v913_v25 = vor.u32 %v1041_v19, %v912_v18 }
   0x8   :  { %v874_v21 = vld [vmem:[%s1820_s0 + $0x8] sm:$0xf0]  ;;  %v1040_v22 = vld [vmem:[%s1820_s0 + $0x54] sm:$0xf]  ;;  %v914_v23 = vld [vmem:[%s1820_s0 + $0x58] sm:$0xf0]  ;;  %v873_v24 = vor.u32 %v1031_v17, %v872_v16 }
   0x9   :  { %v877_v26 = vor.u32 %v1030_v20, %v874_v21  ;;  %v917_v27 = vor.u32 %v1040_v22, %v914_v23  ;;  %v880_v28 = vld [vmem:[%s1820_s0 + $0x10] sm:$0xf]  ;;  %v1033_v29 = vld [vmem:[%s1820_s0 + $0x14] sm:$0xf0]  ;;  %v920_v30 = vld [vmem:[%s1820_s0 + $0x60] sm:$0xf] }
   0xa   :  { %250 = vmatpush.bf16.msra.mxu0 %v1051_v4  ;;  %1072 = vmatpush.bf16.msra.mxu3 %v1051_v4  ;;  %v1043_v31 = vld [vmem:[%s1820_s0 + $0x64] sm:$0xf0]  ;;  %v1032_v32 = vld [vmem:[%s1820_s0 + $0x14] sm:$0xf]  ;;  %v882_v33 = vld [vmem:[%s1820_s0 + $0x18] sm:$0xf0]  ;;  %v881_v36 = vor.u32 %v1033_v29, %v880_v28 }
   0xb   :  { %299 = vmatpush.bf16.msra.mxu1 %v1059_v5  ;;  %1080 = vmatpush.bf16.msra.mxu2 %v1059_v5  ;;  %v1042_v34 = vld [vmem:[%s1820_s0 + $0x64] sm:$0xf]  ;;  %v922_v35 = vld [vmem:[%s1820_s0 + $0x68] sm:$0xf0]  ;;  %v921_v37 = vor.u32 %v1043_v31, %v920_v30  ;;  %v885_v38 = vor.u32 %v1032_v32, %v882_v33  ;;  %v888_v40 = vld [vmem:[%s1820_s0 + $0x20] sm:$0xf] }
   0xc   :  { %v925_v39 = vor.u32 %v1042_v34, %v922_v35  ;;  %v1035_v41 = vld [vmem:[%s1820_s0 + $0x24] sm:$0xf0]  ;;  %v1034_v42 = vld [vmem:[%s1820_s0 + $0x24] sm:$0xf]  ;;  %v928_v43 = vld [vmem:[%s1820_s0 + $0x70] sm:$0xf] }
   0xd   :  { %v1045_v44 = vld [vmem:[%s1820_s0 + $0x74] sm:$0xf0]  ;;  %v890_v45 = vld [vmem:[%s1820_s0 + $0x28] sm:$0xf0]  ;;  %v1044_v46 = vld [vmem:[%s1820_s0 + $0x74] sm:$0xf]  ;;  %v889_v48 = vor.u32 %v1035_v41, %v888_v40 }
   0xe   :  { %251 = vmatpush.bf16.msra.mxu0 %v1050_v6  ;;  %1073 = vmatpush.bf16.msra.mxu3 %v1050_v6  ;;  %v930_v47 = vld [vmem:[%s1820_s0 + $0x78] sm:$0xf0]  ;;  %v929_v49 = vor.u32 %v1045_v44, %v928_v43  ;;  %v893_v50 = vor.u32 %v1034_v42, %v890_v45  ;;  %v896_v52 = vld [vmem:[%s1820_s0 + $0x30] sm:$0xf]  ;;  %v1037_v53 = vld [vmem:[%s1820_s0 + $0x34] sm:$0xf0] }
   0xf   :  { %300 = vmatpush.bf16.msra.mxu1 %v1058_v7  ;;  %1081 = vmatpush.bf16.msra.mxu2 %v1058_v7  ;;  %v933_v51 = vor.u32 %v1044_v46, %v930_v47  ;;  %v1036_v54 = vld [vmem:[%s1820_s0 + $0x34] sm:$0xf]  ;;  %v898_v55 = vld [vmem:[%s1820_s0 + $0x38] sm:$0xf0]  ;;  %v897_v56 = vor.u32 %v1037_v53, %v896_v52  ;;  %v904_v58 = vld [vmem:[%s1820_s0 + $0x40] sm:$0xf] }
  0x10   :  { %v901_v57 = vor.u32 %v1036_v54, %v898_v55  ;;  %v1039_v59 = vld [vmem:[%s1820_s0 + $0x44] sm:$0xf0]  ;;  %v1038_v60 = vld [vmem:[%s1820_s0 + $0x44] sm:$0xf]  ;;  %v906_v61 = vld [vmem:[%s1820_s0 + $0x48] sm:$0xf0] }
  0x11   :  { %v905_v62 = vor.u32 %v1039_v59, %v904_v58  ;;  %v909_v63 = vor.u32 %v1038_v60, %v906_v61  ;;  %v1305_v0 = vld [vmem:[%s1819_s2] ss:$0 sm:$0xff] }
  0x12   :  { %252 = vmatpush.bf16.msra.mxu0 %v1049_v8  ;;  %1074 = vmatpush.bf16.msra.mxu3 %v1049_v8 }
  0x13   :  { %301 = vmatpush.bf16.msra.mxu1 %v1057_v9  ;;  %1082 = vmatpush.bf16.msra.mxu2 %v1057_v9 }
  0x16   :  { %253 = vmatpush.bf16.msra.mxu0 %v1048_v10  ;;  %1075 = vmatpush.bf16.msra.mxu3 %v1048_v10 }
  0x17   :  { %302 = vmatpush.bf16.msra.mxu1 %v1056_v11  ;;  %1083 = vmatpush.bf16.msra.mxu2 %v1056_v11 }
  0x1a   :  { %254 = vmatpush.bf16.msra.mxu0 %v1047_v12  ;;  %1076 = vmatpush.bf16.msra.mxu3 %v1047_v12 }
  0x1b   :  { %303 = vmatpush.bf16.msra.mxu1 %v1055_v13  ;;  %1084 = vmatpush.bf16.msra.mxu2 %v1055_v13 }
  0x1e   :  { %255 = vmatpush.bf16.msra.mxu0 %v1046_v14  ;;  %1077 = vmatpush.bf16.msra.mxu3 %v1046_v14 }
  0x1f   :  { %304 = vmatpush.bf16.msra.mxu1 %v1054_v15  ;;  %1085 = vmatpush.bf16.msra.mxu2 %v1054_v15 }
  0x21   :  { %256 = vmatmul.bf16.vlgmr.msra.gmra.mxu0 %v873_v24  ;;  %281 = vmatmul.bf16.vlgmr.msra.gmra.mxu3 %v913_v25 }
  0x22   :  { %305 = vmatmul.bf16.vlgmr.msra.gmra.mxu1 %v877_v26  ;;  %330 = vmatmul.bf16.vlgmr.msra.gmra.mxu2 %v917_v27 }
  0x31   :  { %261 = vmatmul.bf16.gmra.mxu0 %v881_v36  ;;  %286 = vmatmul.bf16.gmra.mxu3 %v921_v37 }
  0x32   :  { %310 = vmatmul.bf16.gmra.mxu1 %v885_v38  ;;  %335 = vmatmul.bf16.gmra.mxu2 %v925_v39 }
  0x41   :  { %266 = vmatmul.bf16.gmra.mxu0 %v889_v48  ;;  %291 = vmatmul.bf16.gmra.mxu3 %v929_v49 }
  0x42   :  { %315 = vmatmul.bf16.gmra.mxu1 %v893_v50  ;;  %340 = vmatmul.bf16.gmra.mxu2 %v933_v51 }
  0x51   :  { %271 = vmatmul.bf16.gmra.mxu0 %v897_v56 }
  0x52   :  { %320 = vmatmul.bf16.gmra.mxu1 %v901_v57 }
  0x61   :  { %276 = vmatmul.bf16.gmra.mxu0 %v905_v62 }
  0x62   :  { %325 = vmatmul.bf16.gmra.mxu1 %v909_v63 }
  0x9e   :  { %v257_v1 = vpop.f32.mrf.mxu0 }
  0x9f   :  { %v258_v2 = vadd.f32 %v1305_v0, %v257_v1  ;;  %v306_v3 = vpop.f32.mrf.mxu1 }
  0xa1   :  { %v1308_v4 = vadd.f32 %v306_v3, %v258_v2  ;;  %v1126_v2 = vmov 128.0  }
  0xa2   :  { %1090 = vrcp.f32 %v1126_v2 }
  0xa3   :  { %346 = vadd.xlane.f32.xlu0 %v1308_v4 }
  0xa4   :  { %v282_v5 = vpop.f32.mrf.mxu3 }
  0xa5   :  { %v283_v6 = vadd.f32 %v1305_v0, %v282_v5  ;;  %v331_v7 = vpop.f32.mrf.mxu2 }
  0xa6   :  { %v259_v8 = vpop.f32.mrf.mxu0 }
  0xa7   :  { %v260_v9 = vadd.f32 %v1305_v0, %v259_v8  ;;  %v308_v10 = vpop.f32.mrf.mxu1  ;;  %v1313_v11 = vadd.f32 %v331_v7, %v283_v6 }
  0xa8   :  { %v1091_v3 = vpop.eup %1090 }
  0xa9   :  { %v1315_v12 = vadd.f32 %v308_v10, %v260_v9  ;;  %366 = vadd.xlane.f32.xlu1 %v1313_v11  ;;  %v379_v5 = vmul.f32 128.0, %v1091_v3  ;;  %vm383_vm0 = vweird.f32 %v1091_v3 }
  0xab   :  { %348 = vadd.xlane.f32.xlu0 %v1315_v12  ;;  %v380_v6 = vsub.f32 1.0, %v379_v5 }
  0xac   :  { %v284_v13 = vpop.f32.mrf.mxu3 }
  0xad   :  { %v285_v14 = vadd.f32 %v1305_v0, %v284_v13  ;;  %v333_v15 = vpop.f32.mrf.mxu2  ;;  %v381_v7 = vmul.f32 %v1091_v3, %v380_v6 }
  0xae   :  { %v262_v16 = vpop.f32.mrf.mxu0 }
  0xaf   :  { %v263_v17 = vadd.f32 %v1305_v0, %v262_v16  ;;  %v311_v18 = vpop.f32.mrf.mxu1  ;;  %v1321_v19 = vadd.f32 %v333_v15, %v285_v14  ;;  %v382_v8 = vadd.f32 %v1091_v3, %v381_v7 }
  0xb1   :  { %v1323_v20 = vadd.f32 %v311_v18, %v263_v17  ;;  %368 = vadd.xlane.f32.xlu2 %v1321_v19  ;;  %v1371_v9 = vsel %vm383_vm0, %v1091_v3, %v382_v8 }
  0xb3   :  { %350 = vadd.xlane.f32.xlu1 %v1323_v20 }
  0xb4   :  { %v287_v21 = vpop.f32.mrf.mxu3 }
  0xb5   :  { %v288_v22 = vadd.f32 %v1305_v0, %v287_v21  ;;  %v336_v23 = vpop.f32.mrf.mxu2 }
  0xb6   :  { %v264_v24 = vpop.f32.mrf.mxu0 }
  0xb7   :  { %v265_v25 = vadd.f32 %v1305_v0, %v264_v24  ;;  %v313_v26 = vpop.f32.mrf.mxu1  ;;  %v1329_v27 = vadd.f32 %v336_v23, %v288_v22 }
  0xb9   :  { %v1331_v28 = vadd.f32 %v313_v26, %v265_v25  ;;  %370 = vadd.xlane.f32.xlu0 %v1329_v27 }
  0xbb   :  { %352 = vadd.xlane.f32.xlu1 %v1331_v28 }
  0xbc   :  { %v289_v44 = vpop.f32.mrf.mxu3 }
  0xbd   :  { %v338_v46 = vpop.f32.mrf.mxu2  ;;  %v290_v47 = vadd.f32 %v1305_v0, %v289_v44 }
  0xbe   :  { %v267_v29 = vpop.f32.mrf.mxu0 }
  0xbf   :  { %v268_v30 = vadd.f32 %v1305_v0, %v267_v29  ;;  %v316_v31 = vpop.f32.mrf.mxu1  ;;  %v1353_v52 = vadd.f32 %v338_v46, %v290_v47 }
  0xc1   :  { %v1336_v32 = vadd.f32 %v316_v31, %v268_v30 }
  0xc3   :  { %354 = vadd.xlane.f32.xlu2 %v1336_v32 }
  0xc4   :  { %v292_v51 = vpop.f32.mrf.mxu3 }
  0xc5   :  { %v293_v54 = vadd.f32 %v1305_v0, %v292_v51  ;;  %v341_v55 = vpop.f32.mrf.mxu2 }
  0xc6   :  { %v269_v33 = vpop.f32.mrf.mxu0 }
  0xc7   :  { %v270_v34 = vadd.f32 %v1305_v0, %v269_v33  ;;  %v318_v35 = vpop.f32.mrf.mxu1  ;;  %v1360_v57 = vadd.f32 %v341_v55, %v293_v54 }
  0xc9   :  { %v1340_v36 = vadd.f32 %v318_v35, %v270_v34 }
  0xcb   :  { %356 = vadd.xlane.f32.xlu2 %v1340_v36 }
  0xcc   :  { %v294_v61 = vpop.f32.mrf.mxu3 }
  0xcd   :  { %v295_v62 = vadd.f32 %v1305_v0, %v294_v61  ;;  %v343_v63 = vpop.f32.mrf.mxu2 }
  0xce   :  { %v272_v37 = vpop.f32.mrf.mxu0 }
  0xcf   :  { %v273_v38 = vadd.f32 %v1305_v0, %v272_v37  ;;  %v321_v39 = vpop.f32.mrf.mxu1  ;;  %v1368_v1 = vadd.f32 %v343_v63, %v295_v62 }
  0xd1   :  { %v1344_v40 = vadd.f32 %v321_v39, %v273_v38 }
  0xd3   :  { %358 = vadd.xlane.f32.xlu0 %v1344_v40 }
  0xd6   :  { %v274_v41 = vpop.f32.mrf.mxu0 }
  0xd7   :  { %v275_v42 = vadd.f32 %v1305_v0, %v274_v41  ;;  %v323_v43 = vpop.f32.mrf.mxu1 }
  0xd9   :  { %v1348_v45 = vadd.f32 %v323_v43, %v275_v42 }
  0xdb   :  { %360 = vadd.xlane.f32.xlu1 %v1348_v45 }
  0xde   :  { %v277_v48 = vpop.f32.mrf.mxu0 }
  0xdf   :  { %v278_v49 = vadd.f32 %v1305_v0, %v277_v48  ;;  %v326_v50 = vpop.f32.mrf.mxu1 }
  0xe1   :  { %v1355_v53 = vadd.f32 %v326_v50, %v278_v49 }
  0xe3   :  { %362 = vadd.xlane.f32.xlu2 %v1355_v53  ;;  %372 = vadd.xlane.f32.xlu1 %v1353_v52 }
  0xe6   :  { %v279_v56 = vpop.f32.mrf.mxu0 }
  0xe7   :  { %v280_v58 = vadd.f32 %v1305_v0, %v279_v56  ;;  %v328_v59 = vpop.f32.mrf.mxu1 }
  0xe9   :  { %v1363_v60 = vadd.f32 %v328_v59, %v280_v58 }
  0xeb   :  { %374 = vadd.xlane.f32.xlu2 %v1360_v57  ;;  %364 = vadd.xlane.f32.xlu0 %v1363_v60 }
  0xf3   :  { %376 = vadd.xlane.f32.xlu0 %v1368_v1 }
 0x116   :  { %v347_v10 = vpop.xlane.xlu0 %346 }
 0x117   :  { %v385_v13 = vmul.f32 %v1371_v9, %v347_v10 }
 0x119   :  { %v1375_v0 = vsub.f32 %v1308_v4, %v385_v13 }
 0x11b   :  { %v417_v14 = vmul.f32 %v1375_v0, %v1375_v0 }
 0x11c   :  { %v367_v15 = vpop.xlane.xlu1 %366 }
 0x11d   :  { %v395_v16 = vmul.f32 %v1371_v9, %v367_v15  ;;  %433 = vadd.xlane.f32.xlu1 %v417_v14 }
 0x11e   :  { %v349_v17 = vpop.xlane.xlu0 %348 }
 0x11f   :  { %v1381_v18 = vsub.f32 %v1313_v11, %v395_v16  ;;  %v386_v21 = vmul.f32 %v1371_v9, %v349_v17 }
 0x121   :  { %v427_v22 = vmul.f32 %v1381_v18, %v1381_v18  ;;  %v1387_v4 = vsub.f32 %v1315_v12, %v386_v21 }
 0x123   :  { %453 = vadd.xlane.f32.xlu2 %v427_v22  ;;  %v418_v30 = vmul.f32 %v1387_v4, %v1387_v4 }
 0x124   :  { %v369_v23 = vpop.xlane.xlu2 %368 }
 0x125   :  { %v396_v24 = vmul.f32 %v1371_v9, %v369_v23 }
 0x126   :  { %v351_v25 = vpop.xlane.xlu1 %350 }
 0x127   :  { %v1391_v26 = vsub.f32 %v1321_v19, %v396_v24  ;;  %v387_v29 = vmul.f32 %v1371_v9, %v351_v25 }
 0x129   :  { %v428_v11 = vmul.f32 %v1391_v26, %v1391_v26  ;;  %v1399_v12 = vsub.f32 %v1323_v20, %v387_v29 }
 0x12b   :  { %455 = vadd.xlane.f32.xlu0 %v428_v11  ;;  %435 = vadd.xlane.f32.xlu2 %v418_v30  ;;  %v419_v37 = vmul.f32 %v1399_v12, %v1399_v12 }
 0x12c   :  { %v371_v31 = vpop.xlane.xlu0 %370 }
 0x12d   :  { %v397_v33 = vmul.f32 %v1371_v9, %v371_v31 }
 0x12e   :  { %v353_v34 = vpop.xlane.xlu1 %352 }
 0x12f   :  { %v1403_v19 = vsub.f32 %v1329_v27, %v397_v33  ;;  %v388_v35 = vmul.f32 %v1371_v9, %v353_v34 }
 0x131   :  { %v429_v38 = vmul.f32 %v1403_v19, %v1403_v19  ;;  %v1411_v39 = vsub.f32 %v1331_v28, %v388_v35 }
 0x133   :  { %437 = vadd.xlane.f32.xlu0 %v419_v37  ;;  %457 = vadd.xlane.f32.xlu1 %v429_v38  ;;  %v420_v27 = vmul.f32 %v1411_v39, %v1411_v39 }
 0x136   :  { %v355_v20 = vpop.xlane.xlu2 %354 }
 0x137   :  { %v389_v41 = vmul.f32 %v1371_v9, %v355_v20 }
 0x139   :  { %v1415_v42 = vsub.f32 %v1336_v32, %v389_v41 }
 0x13b   :  { %439 = vadd.xlane.f32.xlu1 %v420_v27  ;;  %v421_v43 = vmul.f32 %v1415_v42, %v1415_v42 }
 0x13d   :  { %441 = vadd.xlane.f32.xlu2 %v421_v43 }
 0x13e   :  { %v357_v44 = vpop.xlane.xlu2 %356 }
 0x13f   :  { %v390_v46 = vmul.f32 %v1371_v9, %v357_v44 }
 0x141   :  { %v1423_v28 = vsub.f32 %v1340_v36, %v390_v46 }
 0x143   :  { %v422_v47 = vmul.f32 %v1423_v28, %v1423_v28 }
 0x145   :  { %443 = vadd.xlane.f32.xlu0 %v422_v47 }
 0x146   :  { %v359_v32 = vpop.xlane.xlu0 %358 }
 0x147   :  { %v391_v48 = vmul.f32 %v1371_v9, %v359_v32 }
 0x149   :  { %v1429_v49 = vsub.f32 %v1344_v40, %v391_v48 }
 0x14b   :  { %v423_v50 = vmul.f32 %v1429_v49, %v1429_v49 }
 0x14d   :  { %445 = vadd.xlane.f32.xlu1 %v423_v50 }
 0x14e   :  { %v361_v51 = vpop.xlane.xlu1 %360 }
 0x14f   :  { %v392_v54 = vmul.f32 %v1371_v9, %v361_v51 }
 0x151   :  { %v1435_v36 = vsub.f32 %v1348_v45, %v392_v54 }
 0x153   :  { %v424_v55 = vmul.f32 %v1435_v36, %v1435_v36 }
 0x155   :  { %447 = vadd.xlane.f32.xlu2 %v424_v55 }
 0x156   :  { %v363_v56 = vpop.xlane.xlu2 %362  ;;  %v373_v58 = vpop.xlane.xlu1 %372 }
 0x157   :  { %v393_v59 = vmul.f32 %v1371_v9, %v363_v56  ;;  %v398_v40 = vmul.f32 %v1371_v9, %v373_v58 }
 0x159   :  { %v1442_v61 = vsub.f32 %v1355_v53, %v393_v59  ;;  %v1445_v62 = vsub.f32 %v1353_v52, %v398_v40 }
 0x15b   :  { %v425_v45 = vmul.f32 %v1442_v61, %v1442_v61  ;;  %v430_v63 = vmul.f32 %v1445_v62, %v1445_v62 }
 0x15d   :  { %449 = vadd.xlane.f32.xlu0 %v425_v45  ;;  %459 = vadd.xlane.f32.xlu2 %v430_v63 }
 0x15e   :  { %v375_v2 = vpop.xlane.xlu2 %374  ;;  %v365_v3 = vpop.xlane.xlu0 %364 }
 0x15f   :  { %v399_v5 = vmul.f32 %v1371_v9, %v375_v2  ;;  %v394_v6 = vmul.f32 %v1371_v9, %v365_v3 }
 0x161   :  { %v1454_v53 = vsub.f32 %v1360_v57, %v399_v5  ;;  %v1457_v52 = vsub.f32 %v1363_v60, %v394_v6 }
 0x163   :  { %v431_v7 = vmul.f32 %v1454_v53, %v1454_v53  ;;  %v426_v8 = vmul.f32 %v1457_v52, %v1457_v52 }
 0x165   :  { %461 = vadd.xlane.f32.xlu0 %v431_v7  ;;  %451 = vadd.xlane.f32.xlu1 %v426_v8 }
 0x166   :  { %v377_v10 = vpop.xlane.xlu0 %376 }
 0x167   :  { %v400_v13 = vmul.f32 %v1371_v9, %v377_v10 }
 0x169   :  { %v1465_v14 = vsub.f32 %v1368_v1, %v400_v13 }
 0x16b   :  { %v432_v57 = vmul.f32 %v1465_v14, %v1465_v14 }
 0x16d   :  { %463 = vadd.xlane.f32.xlu1 %v432_v57 }
 0x190   :  { %v434_v60 = vpop.xlane.xlu1 %433 }
 0x191   :  { %v465_v16 = vmul.f32 %v434_v60, %v1371_v9 }
 0x193   :  { %v1470_v22 = vadd.f32 1e-05, %v465_v16 }
 0x195   :  { %1092 = vrsqrt.f32 %v1470_v22  ;;  %vm503_vm2 = vweird.f32 %v1470_v22 }
 0x196   :  { %v454_v15 = vpop.xlane.xlu2 %453 }
 0x197   :  { %v475_v24 = vmul.f32 %v454_v15, %v1371_v9 }
 0x199   :  { %v1474_v25 = vadd.f32 1e-05, %v475_v24 }
 0x19b   :  { %1094 = vrsqrt.f32 %v1474_v25  ;;  %v1483_v37 = vpop.eup %1092  ;;  %vm603_vm4 = vweird.f32 %v1474_v25 }
 0x19c   :  { %v498_v27 = vmul.f32 %v1483_v37, %v1470_v22  ;;  %vm504_vm1 = vweird.f32 %v1483_v37 }
 0x19d   :  { %vm1551_vm3 = vmor %vm503_vm2, %vm504_vm1 }
 0x19e   :  { %v456_v17 = vpop.xlane.xlu0 %455  ;;  %v436_v23 = vpop.xlane.xlu2 %435  ;;  %v499_v32 = vmul.f32 %v1483_v37, %v498_v27 }
 0x19f   :  { %v466_v1 = vmul.f32 %v436_v23, %v1371_v9  ;;  %v476_v29 = vmul.f32 %v456_v17, %v1371_v9 }
 0x1a0   :  { %v500_v59 = vmul.f32 0.5, %v499_v32 }
 0x1a1   :  { %v1480_v34 = vadd.f32 1e-05, %v466_v1  ;;  %v1485_v38 = vadd.f32 1e-05, %v476_v29  ;;  %v1498_v46 = vpop.eup %1094 }
 0x1a2   :  { %v598_v50 = vmul.f32 %v1498_v46, %v1474_v25  ;;  %v501_v8 = vsub.f32 1.5, %v500_v59  ;;  %vm604_vm5 = vweird.f32 %v1498_v46 }
 0x1a3   :  { %1096 = vrsqrt.f32 %v1480_v34  ;;  %vm513_vm6 = vweird.f32 %v1480_v34  ;;  %vm613_vm7 = vweird.f32 %v1485_v38  ;;  %vm1584_vm8 = vmor %vm603_vm4, %vm604_vm5 }
 0x1a4   :  { %1098 = vrsqrt.f32 %v1485_v38  ;;  %v599_v40 = vmul.f32 %v1498_v46, %v598_v50  ;;  %v502_v24 = vmul.f32 %v1483_v37, %v501_v8 }
 0x1a6   :  { %v458_v21 = vpop.xlane.xlu1 %457  ;;  %v438_v11 = vpop.xlane.xlu0 %437  ;;  %v600_v13 = vmul.f32 0.5, %v599_v40  ;;  %v506_v22 = vsel %vm1551_vm3, %v1483_v37, %v502_v24 }
 0x1a7   :  { %v467_v35 = vmul.f32 %v438_v11, %v1371_v9  ;;  %v477_v54 = vmul.f32 %v458_v21, %v1371_v9  ;;  %v1574_v37 = vmul.f32 %v506_v22, %v1375_v0 }
 0x1a8   :  { %v601_v1 = vsub.f32 1.5, %v600_v13 }
 0x1a9   :  { %v1493_v43 = vadd.f32 1e-05, %v467_v35  ;;  %v1507_v51 = vpop.eup %1096  ;;  %v1523_v3 = vadd.f32 1e-05, %v477_v54 }
 0x1aa   :  { %v1512_v56 = vpop.eup %1098  ;;  %v508_v45 = vmul.f32 %v1507_v51, %v1480_v34  ;;  %v1566_v54 = vmul.f32 %v1498_v46, %v601_v1  ;;  %vm514_vm9 = vweird.f32 %v1507_v51 }
 0x1ab   :  { %v608_v2 = vmul.f32 %v1512_v56, %v1485_v38  ;;  %vm614_vm10 = vweird.f32 %v1512_v56  ;;  %vm523_vm11 = vweird.f32 %v1493_v43  ;;  %vm1609_vm14 = vmor %vm513_vm6, %vm514_vm9 }
 0x1ac   :  { %v509_v57 = vmul.f32 %v1507_v51, %v508_v45  ;;  %vm1627_vm0 = vmor %vm613_vm7, %vm614_vm10 }
 0x1ad   :  { %v609_v15 = vmul.f32 %v1512_v56, %v608_v2 }
 0x1ae   :  { %v440_v30 = vpop.xlane.xlu1 %439  ;;  %v510_v29 = vmul.f32 0.5, %v509_v57 }
 0x1af   :  { %v468_v31 = vmul.f32 %v440_v30, %v1371_v9 }
 0x1b0   :  { %v442_v33 = vpop.xlane.xlu2 %441  ;;  %v511_v59 = vsub.f32 1.5, %v510_v29 }
 0x1b1   :  { %v469_v20 = vmul.f32 %v442_v33, %v1371_v9  ;;  %v1488_v41 = vadd.f32 1e-05, %v468_v31  ;;  %v610_v31 = vmul.f32 0.5, %v609_v15 }
 0x1b2   :  { %v512_v25 = vmul.f32 %v1507_v51, %v511_v59 }
 0x1b3   :  { %v1496_v44 = vadd.f32 1e-05, %v469_v20  ;;  %1100 = vrsqrt.f32 %v1488_v41  ;;  %v1127_v20 = vmov 16.0   ;;  %vm533_vm1 = vweird.f32 %v1488_v41 }
 0x1b4   :  { %1102 = vrsqrt.f32 %v1493_v43  ;;  %v516_v34 = vsel %vm1609_vm14, %v1507_v51, %v512_v25 }
 0x1b5   :  { %1104 = vrsqrt.f32 %v1496_v44  ;;  %vm543_vm7 = vweird.f32 %v1496_v44 }
 0x1b8   :  { %v444_v47 = vpop.xlane.xlu0 %443 }
 0x1b9   :  { %v470_v48 = vmul.f32 %v444_v47, %v1371_v9  ;;  %v1514_v58 = vpop.eup %1100 }
 0x1ba   :  { %v1519_v63 = vpop.eup %1102  ;;  %v528_v6 = vmul.f32 %v1514_v58, %v1488_v41  ;;  %vm534_vm13 = vweird.f32 %v1514_v58 }
 0x1bb   :  { %v1510_v55 = vadd.f32 1e-05, %v470_v48  ;;  %v1526_v5 = vpop.eup %1104  ;;  %v518_v60 = vmul.f32 %v1519_v63, %v1493_v43  ;;  %vm524_vm12 = vweird.f32 %v1519_v63  ;;  %vm1638_vm3 = vmor %vm533_vm1, %vm534_vm13 }
 0x1bc   :  { %v538_v16 = vmul.f32 %v1526_v5, %v1496_v44  ;;  %v529_v21 = vmul.f32 %v1514_v58, %v528_v6  ;;  %v611_v6 = vsub.f32 1.5, %v610_v31  ;;  %vm544_vm2 = vweird.f32 %v1526_v5  ;;  %vm1666_vm6 = vmor %vm523_vm11, %vm524_vm12 }
 0x1bd   :  { %1106 = vrsqrt.f32 %v1510_v55  ;;  %v519_v11 = vmul.f32 %v1519_v63, %v518_v60  ;;  %vm553_vm4 = vweird.f32 %v1510_v55  ;;  %v658_v60 = vmul.f32 %v516_v34, %v1387_v4 }
 0x1be   :  { %1108 = vrsqrt.f32 %v1523_v3  ;;  %v539_v33 = vmul.f32 %v1526_v5, %v538_v16  ;;  %v530_v27 = vmul.f32 0.5, %v529_v21  ;;  %v606_v16 = vsel %vm1584_vm8, %v1498_v46, %v1566_v54  ;;  %vm1684_vm8 = vmor %vm543_vm7, %vm544_vm2 }
 0x1bf   :  { %v520_v40 = vmul.f32 0.5, %v519_v11  ;;  %v612_v1 = vmul.f32 %v1512_v56, %v611_v6 }
 0x1c0   :  { %v446_v7 = vpop.xlane.xlu1 %445  ;;  %v531_v13 = vsub.f32 1.5, %v530_v27 }
 0x1c1   :  { %v471_v10 = vmul.f32 %v446_v7, %v1371_v9  ;;  %v540_v7 = vmul.f32 0.5, %v539_v33  ;;  %v521_v21 = vsub.f32 1.5, %v520_v40  ;;  %v616_v41 = vsel %vm1627_vm0, %v1512_v56, %v612_v1 }
 0x1c2   :  { %vm623_vm0 = vweird.f32 %v1523_v3 }
 0x1c3   :  { %v1538_v17 = vadd.f32 1e-05, %v471_v10  ;;  %v1541_v23 = vpop.eup %1106  ;;  %v541_v29 = vsub.f32 1.5, %v540_v7 }
 0x1c4   :  { %v548_v30 = vmul.f32 %v1541_v23, %v1510_v55  ;;  %v1557_v48 = vpop.eup %1108  ;;  %vm554_vm15 = vweird.f32 %v1541_v23 }
 0x1c5   :  { %1110 = vrsqrt.f32 %v1538_v17  ;;  %v618_v10 = vmul.f32 %v1557_v48, %v1523_v3  ;;  %v542_v38 = vmul.f32 %v1526_v5, %v541_v29  ;;  %vm1656_vm5 = vmor %vm553_vm4, %vm554_vm15  ;;  %vm563_vm10 = vweird.f32 %v1538_v17 }
 0x1c6   :  { %1112 = vrcp.f32 %v1127_v20  ;;  %v549_v47 = vmul.f32 %v1541_v23, %v548_v30  ;;  %v532_v30 = vmul.f32 %v1514_v58, %v531_v13  ;;  %v1068_v13 = vld [vmem:[%s1822_s3 + $0x30] sm:$0xff]  ;;  %vm624_vm14 = vweird.f32 %v1557_v48 }
 0x1c7   :  { %v619_v11 = vmul.f32 %v1557_v48, %v618_v10  ;;  %vm1752_vm1 = vmor %vm623_vm0, %vm624_vm14 }
 0x1c8   :  { %v448_v32 = vpop.xlane.xlu2 %447  ;;  %v550_v45 = vmul.f32 0.5, %v549_v47 }
 0x1c9   :  { %v472_v50 = vmul.f32 %v448_v32, %v1371_v9  ;;  %v1069_v32 = vld [vmem:[%s1822_s3 + $0x38] sm:$0xff]  ;;  %v620_v10 = vmul.f32 0.5, %v619_v11 }
 0x1ca   :  { %v551_v0 = vsub.f32 1.5, %v550_v45  ;;  %852 = vmatpush.bf16.msrb.mxu2 %v1069_v32  ;;  %v536_v45 = vsel %vm1638_vm3, %v1514_v58, %v532_v30 }
 0x1cb   :  { %v1568_v2 = vpop.eup %1110  ;;  %v1571_v8 = vadd.f32 1e-05, %v472_v50  ;;  %v522_v50 = vmul.f32 %v1519_v63, %v521_v21  ;;  %v621_v29 = vsub.f32 1.5, %v620_v10 }
 0x1cc   :  { %v558_v57 = vmul.f32 %v1568_v2, %v1538_v17  ;;  %v1591_v15 = vpop.eup %1112  ;;  %v552_v20 = vmul.f32 %v1541_v23, %v551_v0  ;;  %v668_v0 = vmul.f32 %v616_v41, %v1391_v26  ;;  %vm564_vm9 = vweird.f32 %v1568_v2  ;;  %v1065_v41 = vld [vmem:[%s1822_s3 + $0x18] sm:$0xff] }
 0x1cd   :  { %1114 = vrsqrt.f32 %v1571_v8  ;;  %v526_v43 = vsel %vm1666_vm6, %v1519_v63, %v522_v50  ;;  %v546_v63 = vsel %vm1684_vm8, %v1526_v5, %v542_v38  ;;  %v1067_v5 = vld [vmem:[%s1822_s3 + $0x28] sm:$0xff]  ;;  %vm1712_vm12 = vmor %vm563_vm10, %vm564_vm9  ;;  %vm573_vm13 = vweird.f32 %v1571_v8 }
 0x1ce   :  { %v559_v24 = vmul.f32 %v1568_v2, %v558_v57  ;;  %v556_v58 = vsel %vm1656_vm5, %v1541_v23, %v552_v20  ;;  %v667_v57 = vmul.f32 %v606_v16, %v1381_v18  ;;  %v660_v18 = vmul.f32 %v536_v45, %v1411_v39  ;;  %853 = vmatpush.bf16.msrb.mxu2 %v1068_v13 }
 0x1cf   :  { %v662_v16 = vmul.f32 %v556_v58, %v1423_v28  ;;  %v659_v4 = vmul.f32 %v526_v43, %v1399_v12  ;;  %v661_v28 = vmul.f32 %v546_v63, %v1415_v42  ;;  %v622_v32 = vmul.f32 %v1557_v48, %v621_v29 }
 0x1d0   :  { %v560_v31 = vmul.f32 0.5, %v559_v24  ;;  %v460_v46 = vpop.xlane.xlu2 %459  ;;  %v450_v33 = vpop.xlane.xlu0 %449  ;;  %v708_v45 = vadd.f32 %v668_v0, %v667_v57  ;;  %v730_v63 = vmul.f32 16.0, %v1591_v15  ;;  %vm734_vm14 = vweird.f32 %v1591_v15 }
 0x1d1   :  { %v478_v27 = vmul.f32 %v460_v46, %v1371_v9  ;;  %v473_v47 = vmul.f32 %v450_v33, %v1371_v9  ;;  %v687_v17 = vadd.f32 %v662_v16, %v661_v28  ;;  %v626_v58 = vsel %vm1752_vm1, %v1557_v48, %v622_v32 }
 0x1d2   :  { %v561_v55 = vsub.f32 1.5, %v560_v31  ;;  %v680_v31 = vadd.f32 %v660_v18, %v659_v4  ;;  %854 = vmatpush.bf16.msrb.mxu2 %v1067_v5  ;;  %v669_v29 = vmul.f32 %v626_v58, %v1403_v19  ;;  %v1063_v5 = vld [vmem:[%s1822_s3 + $0x8] sm:$0xff] }
 0x1d3   :  { %v1634_v54 = vpop.eup %1114  ;;  %v1644_v59 = vadd.f32 1e-05, %v478_v27  ;;  %v1646_v40 = vadd.f32 1e-05, %v473_v47  ;;  %v673_v47 = vadd.f32 %v658_v60, %v1574_v37 }
 0x1d4   :  { %v568_v7 = vmul.f32 %v1634_v54, %v1571_v8  ;;  %v562_v25 = vmul.f32 %v1568_v2, %v561_v55  ;;  %vm574_vm11 = vweird.f32 %v1634_v54  ;;  %v681_v22 = vrot.slane %v680_v31, 4 }
 0x1d5   :  { %1116 = vrsqrt.f32 %v1644_v59  ;;  %vm575_vm15 = vmor %vm573_vm13, %vm574_vm11  ;;  %vm633_vm3 = vweird.f32 %v1644_v59  ;;  %vm583_vm6 = vweird.f32 %v1646_v40 }
 0x1d6   :  { %v569_v23 = vmul.f32 %v1634_v54, %v568_v7  ;;  %1118 = vrsqrt.f32 %v1646_v40  ;;  %v566_v35 = vsel %vm1712_vm12, %v1568_v2, %v562_v25  ;;  %v1066_v2 = vld [vmem:[%s1822_s3 + $0x20] sm:$0xff]  ;;  %v674_v7 = vrot.slane %v673_v47, 4 }
 0x1d7   :  { %v663_v50 = vmul.f32 %v566_v35, %v1429_v49  ;;  %855 = vmatpush.bf16.msrb.mxu2 %v1066_v2  ;;  %v682_v57 = vadd.f32 %v681_v22, %v680_v31  ;;  %v709_v25 = vrot.slane %v708_v45, 4  ;;  %v731_v31 = vsub.f32 1.0, %v730_v63  ;;  %v1062_v2 = vld [vmem:[%s1822_s3] sm:$0xff] }
 0x1d8   :  { %v570_v21 = vmul.f32 0.5, %v569_v23  ;;  %v452_v24 = vpop.xlane.xlu1 %451  ;;  %v462_v1 = vpop.xlane.xlu0 %461  ;;  %v1064_v23 = vld [vmem:[%s1822_s3 + $0x10] sm:$0xff]  ;;  %v675_v16 = vadd.f32 %v674_v7, %v673_v47 }
 0x1d9   :  { %v474_v26 = vmul.f32 %v452_v24, %v1371_v9  ;;  %v479_v39 = vmul.f32 %v462_v1, %v1371_v9  ;;  %v683_v4 = vrot.slane %v682_v57, 2 }
 0x1da   :  { %v571_v11 = vsub.f32 1.5, %v570_v21  ;;  %v676_v12 = vrot.slane %v675_v16, 2 }
 0x1db   :  { %v1708_v30 = vpop.eup %1116  ;;  %v1717_v46 = vadd.f32 1e-05, %v474_v26  ;;  %v1719_v33 = vadd.f32 1e-05, %v479_v39  ;;  %856 = vmatpush.bf16.msrb.mxu2 %v1065_v41 }
 0x1dc   :  { %v1721_v42 = vpop.eup %1118  ;;  %v572_v20 = vmul.f32 %v1634_v54, %v571_v11  ;;  %v628_v27 = vmul.f32 %v1708_v30, %v1644_v59  ;;  %vm634_vm2 = vweird.f32 %v1708_v30 }
 0x1dd   :  { %v578_v8 = vmul.f32 %v1721_v42, %v1646_v40  ;;  %1120 = vrsqrt.f32 %v1717_v46  ;;  %vm635_vm4 = vmor %vm633_vm3, %vm634_vm2  ;;  %vm584_vm5 = vweird.f32 %v1721_v42  ;;  %vm593_vm9 = vweird.f32 %v1717_v46 }
 0x1de   :  { %v576_v34 = vsel %vm575_vm15, %v1634_v54, %v572_v20  ;;  %v629_v37 = vmul.f32 %v1708_v30, %v628_v27  ;;  %1122 = vrsqrt.f32 %v1719_v33  ;;  %v688_v54 = vrot.slane %v687_v17, 4  ;;  %vm1787_vm8 = vmor %vm583_vm6, %vm584_vm5 }
 0x1df   :  { %v664_v51 = vmul.f32 %v576_v34, %v1435_v36  ;;  %v579_v38 = vmul.f32 %v1721_v42, %v578_v8  ;;  %857 = vmatpush.bf16.msrb.mxu2 %v1064_v23  ;;  %v710_v20 = vadd.f32 %v709_v25, %v708_v45  ;;  %v684_v27 = vadd.f32 %v683_v4, %v682_v57 }
 0x1e0   :  { %v630_v6 = vmul.f32 0.5, %v629_v37  ;;  %v464_v55 = vpop.xlane.xlu1 %463  ;;  %v689_v60 = vadd.f32 %v688_v54, %v687_v17  ;;  %vm643_vm12 = vweird.f32 %v1719_v33  ;;  %vm788_vm2 = vcmask 1041409  }
 0x1e1   :  { %v694_v36 = vadd.f32 %v664_v51, %v663_v50  ;;  %v580_v10 = vmul.f32 0.5, %v579_v38  ;;  %v480_v56 = vmul.f32 %v464_v55, %v1371_v9  ;;  %v732_v51 = vmul.f32 %v1591_v15, %v731_v31 }
 0x1e2   :  { %v631_v13 = vsub.f32 1.5, %v630_v6  ;;  %v690_v28 = vrot.slane %v689_v60, 2  ;;  %v677_v38 = vadd.f32 %v676_v12, %v675_v16  ;;  %v685_v49 = vrot.slane %v684_v27, 1 }
 0x1e3   :  { %v1121_v3 = vpop.eup %1120  ;;  %v695_v43 = vrot.slane %v694_v36, 4  ;;  %v1762_v44 = vadd.f32 1e-05, %v480_v56  ;;  %v581_v0 = vsub.f32 1.5, %v580_v10  ;;  %858 = vmatpush.bf16.msrb.mxu2 %v1063_v5  ;;  %v733_v58 = vadd.f32 %v1591_v15, %v732_v51 }
 0x1e4   :  { %v1767_v9 = vpop.eup %1122  ;;  %v632_v48 = vmul.f32 %v1708_v30, %v631_v13  ;;  %v588_v18 = vmul.f32 %v1121_v3, %v1717_v46  ;;  %vm594_vm7 = vweird.f32 %v1121_v3  ;;  %v691_v34 = vadd.f32 %v690_v28, %v689_v60 }
 0x1e5   :  { %v638_v59 = vmul.f32 %v1767_v9, %v1719_v33  ;;  %v696_v21 = vadd.f32 %v695_v43, %v694_v36  ;;  %1124 = vrsqrt.f32 %v1762_v44  ;;  %v582_v11 = vmul.f32 %v1721_v42, %v581_v0  ;;  %vm595_vm10 = vmor %vm593_vm9, %vm594_vm7 }
 0x1e6   :  { %v636_v24 = vsel %vm635_vm4, %v1708_v30, %v632_v48  ;;  %v589_v1 = vmul.f32 %v1121_v3, %v588_v18  ;;  %v692_v36 = vrot.slane %v691_v34, 1  ;;  %vm644_vm11 = vweird.f32 %v1767_v9 }
 0x1e7   :  { %v670_v26 = vmul.f32 %v636_v24, %v1445_v62  ;;  %v639_v39 = vmul.f32 %v1767_v9, %v638_v59  ;;  %v697_v35 = vrot.slane %v696_v21, 2  ;;  %v586_v40 = vsel %vm1787_vm8, %v1721_v42, %v582_v11  ;;  %859 = vmatpush.bf16.msrb.mxu2 %v1062_v2  ;;  %vm645_vm15 = vmor %vm643_vm12, %vm644_vm11 }
 0x1e8   :  { %v590_v30 = vmul.f32 0.5, %v589_v1  ;;  %v665_v6 = vmul.f32 %v586_v40, %v1442_v61  ;;  %v711_v42 = vrot.slane %v710_v20, 2  ;;  %v678_v13 = vrot.slane %v677_v38, 1 }
 0x1e9   :  { %v715_v17 = vadd.f32 %v670_v26, %v669_v29  ;;  %v640_v19 = vmul.f32 0.5, %v639_v39  ;;  %v698_v41 = vadd.f32 %v697_v35, %v696_v21  ;;  %v686_v23 = vadd.f32 %v685_v49, %v684_v27 }
 0x1ea   :  { %v591_v62 = vsub.f32 1.5, %v590_v30  ;;  %v712_v43 = vadd.f32 %v711_v42, %v710_v20  ;;  %v693_v60 = vadd.f32 %v692_v36, %v691_v34  ;;  %vm653_vm0 = vweird.f32 %v1762_v44 }
 0x1eb   :  { %v716_v47 = vrot.slane %v715_v17, 4  ;;  %v1125_v32 = vpop.eup %1124  ;;  %v641_v22 = vsub.f32 1.5, %v640_v19  ;;  %v679_v63 = vadd.f32 %v678_v13, %v677_v38  ;;  %v735_v33 = vsel %vm734_vm14, %v1591_v15, %v733_v58 }
 0x1ec   :  { %v592_v37 = vmul.f32 %v1121_v3, %v591_v62  ;;  %v648_v50 = vmul.f32 %v1125_v32, %v1762_v44  ;;  %vm654_vm13 = vweird.f32 %v1125_v32  ;;  %v713_v24 = vrot.slane %v712_v43, 1 }
 0x1ed   :  { %v717_v54 = vadd.f32 %v716_v47, %v715_v17  ;;  %v642_v10 = vmul.f32 %v1767_v9, %v641_v22  ;;  %vm655_vm1 = vmor %vm653_vm0, %vm654_vm13  ;;  %v737_v1 = vmul.f32 %v735_v33, %v686_v23  ;;  %v738_v26 = vmul.f32 %v735_v33, %v693_v60 }
 0x1ee   :  { %v596_v45 = vsel %vm595_vm10, %v1121_v3, %v592_v37  ;;  %v649_v7 = vmul.f32 %v1125_v32, %v648_v50  ;;  %v699_v3 = vrot.slane %v698_v41, 1  ;;  %v714_v12 = vadd.f32 %v713_v24, %v712_v43 }
 0x1ef   :  { %v666_v55 = vmul.f32 %v596_v45, %v1457_v52  ;;  %v718_v61 = vrot.slane %v717_v54, 2  ;;  %v646_v0 = vsel %vm645_vm15, %v1767_v9, %v642_v10  ;;  %v736_v9 = vmul.f32 %v735_v33, %v679_v63 }
 0x1f0   :  { %v650_v56 = vmul.f32 0.5, %v649_v7  ;;  %v700_v16 = vadd.f32 %v699_v3, %v698_v41  ;;  %v671_v29 = vmul.f32 %v646_v0, %v1454_v53  ;;  %v745_v30 = vpack.c.bf16 %v737_v1, %v737_v1  ;;  %v1089_v3 = vld [vmem:[%s1821_s4] ss:$0 sm:$0xff] }
 0x1f1   :  { %v701_v46 = vadd.f32 %v666_v55, %v665_v6  ;;  %v719_v25 = vadd.f32 %v718_v61, %v717_v54  ;;  %v746_v15 = vpack.c.bf16 %v738_v26, %v738_v26  ;;  %v744_v19 = vpack.c.bf16 %v736_v9, %v736_v9 }
 0x1f2   :  { %v651_v52 = vsub.f32 1.5, %v650_v56  ;;  %v739_v28 = vmul.f32 %v735_v33, %v700_v16  ;;  %v781_v53 = vunpack.c.l.b16 %v745_v30  ;;  %vm790_vm3 = vcmask 1042434  }
 0x1f3   :  { %v702_v57 = vrot.slane %v701_v46, 4  ;;  %v720_v11 = vrot.slane %v719_v25, 1  ;;  %v782_v2 = vunpack.c.l.b16 %v746_v15  ;;  %vm792_vm4 = vcmask 1043459  }
 0x1f4   :  { %v652_v18 = vmul.f32 %v1125_v32, %v651_v52  ;;  %v747_v62 = vpack.c.bf16 %v739_v28, %v739_v28  ;;  %vm794_vm5 = vcmask 1044484   ;;  %vm796_vm6 = vcmask 1045509  }
 0x1f5   :  { %v703_v48 = vadd.f32 %v702_v57, %v701_v46  ;;  %v721_v20 = vadd.f32 %v720_v11, %v719_v25  ;;  %vm798_vm7 = vcmask 1046534   ;;  %vm800_vm8 = vcmask 1047559  }
 0x1f6   :  { %v656_v21 = vsel %vm655_vm1, %v1125_v32, %v652_v18  ;;  %v780_v32 = vunpack.c.l.b16 %v744_v19  ;;  %v783_v40 = vunpack.c.l.b16 %v747_v62 }
 0x1f7   :  { %v704_v59 = vrot.slane %v703_v48, 2  ;;  %v672_v4 = vmul.f32 %v656_v21, %v1465_v14  ;;  %v741_v14 = vmul.f32 %v735_v33, %v714_v12  ;;  %v742_v37 = vmul.f32 %v735_v33, %v721_v20 }
 0x1f8   :  { %v789_v38 = vsel %vm788_vm2, %v781_v53, %v780_v32 }
 0x1f9   :  { %v705_v39 = vadd.f32 %v704_v59, %v703_v48  ;;  %v722_v5 = vadd.f32 %v672_v4, %v671_v29  ;;  %v749_v51 = vpack.c.bf16 %v741_v14, %v741_v14  ;;  %v791_v41 = vsel %vm790_vm3, %v782_v2, %v789_v38 }
 0x1fa   :  { %v793_v54 = vsel %vm792_vm4, %v783_v40, %v791_v41  ;;  %v750_v6 = vpack.c.bf16 %v742_v37, %v742_v37 }
 0x1fb   :  { %v706_v44 = vrot.slane %v705_v39, 1  ;;  %v723_v31 = vrot.slane %v722_v5, 4  ;;  %v785_v42 = vunpack.c.l.b16 %v749_v51 }
 0x1fc   :  { %v786_v46 = vunpack.c.l.b16 %v750_v6 }
 0x1fd   :  { %v707_v17 = vadd.f32 %v706_v44, %v705_v39  ;;  %v724_v35 = vadd.f32 %v723_v31, %v722_v5 }
 0x1ff   :  { %v740_v27 = vmul.f32 %v735_v33, %v707_v17  ;;  %v725_v47 = vrot.slane %v724_v35, 2 }
 0x201   :  { %v748_v8 = vpack.c.bf16 %v740_v27, %v740_v27  ;;  %v726_v34 = vadd.f32 %v725_v47, %v724_v35 }
 0x203   :  { %v784_v22 = vunpack.c.l.b16 %v748_v8  ;;  %v727_v50 = vrot.slane %v726_v34, 1 }
 0x205   :  { %v728_v45 = vadd.f32 %v727_v50, %v726_v34  ;;  %v795_v55 = vsel %vm794_vm5, %v784_v22, %v793_v54 }
 0x206   :  { %v797_v36 = vsel %vm796_vm6, %v785_v42, %v795_v55 }
 0x207   :  { %v743_v7 = vmul.f32 %v735_v33, %v728_v45  ;;  %v799_v56 = vsel %vm798_vm7, %v786_v46, %v797_v36 }
 0x209   :  { %v751_v49 = vpack.c.bf16 %v743_v7, %v743_v7 }
 0x20b   :  { %v787_v10 = vunpack.c.l.b16 %v751_v49 }
 0x20d   :  { %v801_v58 = vsel %vm800_vm8, %v787_v10, %v799_v56 }
 0x20e   :  { %v802_v13 = vpack.c.b16 %v801_v58, %v801_v58 }
 0x210   :  { %860 = vmatmul.bf16.vlgmr.msrb.gmra.mxu2 %v802_v13 }
 0x293   :  { %v861_v61 = vpop.f32.mrf.mxu2 }
 0x294   :  { %v862_v57 = vadd.f32 %v1089_v3, %v861_v61 }
 0x296   :  { %865 = vst [vmem:[%s1823_s5] sm:$0xff] %v862_v57 }
 0x29b   :  { %v863_v52 = vpop.f32.mrf.mxu2 }

</bundles_post_ra>
